<compile_context>
chip_gen: v5e
topology: v5e:2x2
jax: 0.10.0
libtpu: 0.0.40
codegen_flags: <defaults>
</compile_context>

<pallas_src>
import jax
import jax.numpy as jnp
from jax import lax
from jax.experimental import pallas as pl
from jax.experimental.pallas import tpu as pltpu


def _round_up(n: int, m: int) -> int:
    return ((n + m - 1) // m) * m


def _aligned_divisor(n: int, cap: int, align: int):
    """Largest `align`-aligned divisor of n that is <= cap, or None."""
    t = (min(n, cap) // align) * align
    while t >= align:
        if n % t == 0:
            return t
        t -= align
    return None


def _coeffs(lambda_param: float, batch_size: int):
    lam = float(lambda_param)
    inv_b = 1.0 / float(batch_size)
    c_all = lam * inv_b * inv_b            # weight of sum(acc^2)
    c_dsq = (1.0 - lam) * inv_b * inv_b    # extra weight of sum(diag(acc)^2)
    c_d = -2.0 * inv_b                     # weight of sum(diag(acc))
    return c_all, c_dsq, c_d


def _make_fullbatch_kernel(c_all: float, c_dsq: float, c_d: float):
    """Primary path: full-batch (B, td) blocks, no reduction grid axis."""

    def kernel(z1_ref, z2_ref, out_ref):
        # (B, td) x (B, td) contracted over the batch dim -> (td, td) on the
        # MXU, native (bf16) operands, f32 accumulation.
        acc = lax.dot_general(
            z1_ref[...], z2_ref[...],
            dimension_numbers=(((0,), (0,)), ((), ())),
            preferred_element_type=jnp.float32)

        # Every tile contributes lam * sum(c^2) (1/B^2 folded into c_all).
        out_ref[...] = jnp.full((8, 128), c_all * jnp.sum(acc * acc),
                                dtype=jnp.float32)

        # Diagonal terms only on diagonal feature tiles (i == j): compute the
        # unscaled diag directly from the inputs as a column-sum (pure VPU,
        # overlaps with the matmul; no iota / where / second acc read).
        @pl.when(pl.program_id(0) == pl.program_id(1))
        def _diag():
            z1f = z1_ref[...].astype(jnp.float32)
            z2f = z2_ref[...].astype(jnp.float32)
            dvec = jnp.sum(z1f * z2f, axis=0, keepdims=True)   # (1, td)
            diag_term = jnp.sum(c_dsq * dvec * dvec + c_d * dvec)
            out_ref[...] = out_ref[...] + diag_term

    return kernel


def _make_batchtiled_kernel(c_all: float, c_dsq: float, c_d: float):
    """Fallback path: batch-chunked contraction with a resident f32 acc."""

    def kernel(z1_ref, z2_ref, out_ref, acc_ref):
        k = pl.program_id(2)
        nk = pl.num_programs(2)

        @pl.when(k == 0)
        def _init():
            acc_ref[...] = jnp.zeros_like(acc_ref)

        acc_ref[...] += lax.dot_general(
            z1_ref[...], z2_ref[...],
            dimension_numbers=(((0,), (0,)), ((), ())),
            preferred_element_type=jnp.float32)

        @pl.when(k == nk - 1)
        def _finalize_all():
            acc = acc_ref[...]
            out_ref[...] = jnp.full((8, 128), c_all * jnp.sum(acc * acc),
                                    dtype=jnp.float32)

        @pl.when(jnp.logical_and(k == nk - 1,
                                 pl.program_id(0) == pl.program_id(1)))
        def _finalize_diag():
            acc = acc_ref[...]
            td = acc.shape[0]
            rows = lax.broadcasted_iota(jnp.int32, (td, td), 0)
            cols = lax.broadcasted_iota(jnp.int32, (td, td), 1)
            dv = jnp.where(rows == cols, acc, 0.0)
            # Single fused reduction for both diagonal terms.
            out_ref[...] = out_ref[...] + jnp.sum(c_dsq * dv * dv + c_d * dv)

    return kernel


def barlow_twins_loss(z1, z2, lambda_param: float = 0.005, *,
                      compute_dtype=jnp.bfloat16,
                      tile_d: int = None, tile_b: int = None,
                      vmem_budget_bytes: int = 28 * 1024 * 1024):
    """Pallas implementation of BarlowTwinsLoss.forward((z1, z2)).

    compute_dtype: dtype fed to the MXU (default bf16; pass None to keep the
      input dtype). Accumulation is always f32.
    tile_d: feature-tile cap (default 1024; raise to 2048 on v6e with a larger
      vmem_limit if you want to push the roofline).
    tile_b: if given, forces the batch-tiled (k-axis) fallback with this chunk.
    """
    assert z1.ndim == 2 and z1.shape == z2.shape
    b, d = z1.shape
    c_all, c_dsq, c_d = _coeffs(lambda_param, b)

    if compute_dtype is not None:
        z1 = z1.astype(compute_dtype)
        z2 = z2.astype(compute_dtype)
    itemsize = jnp.dtype(z1.dtype).itemsize

    # Zero-pad: columns (features) to a lane multiple, rows (batch) to a
    # sublane multiple. Zero rows/cols contribute nothing to acc / diag, and
    # the "+ D" / 1/B terms use the original d / b.
    d_pad = _round_up(d, 128)
    b_pad = _round_up(b, 8)
    if d_pad != d or b_pad != b:
        pad = ((0, b_pad - b), (0, d_pad - d))
        z1 = jnp.pad(z1, pad)
        z2 = jnp.pad(z2, pad)

    # Feature tile: largest 128-aligned divisor of d_pad under the cap.
    cap_d = int(tile_d) if tile_d is not None else 1024
    td = _aligned_divisor(d_pad, cap_d, 128) or d_pad
    # Keep both "parallel" axes >= 2 where possible so v7x's second TC has work.
    if tile_d is None and d_pad // td == 1 and d_pad % 256 == 0:
        td = d_pad // 2
    ni = d_pad // td

    # Path selection: drop the k axis whenever the full-batch column blocks
    # (2 operands x double buffer) fit the VMEM budget.
    fullbatch_bytes = 2 * 2 * b_pad * td * itemsize
    use_batch_tiling = (tile_b is not None) or (fullbatch_bytes > vmem_budget_bytes)

    if not use_batch_tiling:
        kernel = _make_fullbatch_kernel(c_all, c_dsq, c_d)
        grid = (ni, ni)
        in_specs = [
            pl.BlockSpec((b_pad, td), lambda i, j: (0, i)),
            pl.BlockSpec((b_pad, td), lambda i, j: (0, j)),
        ]
        out_specs = pl.BlockSpec((8, 128), lambda i, j: (i, j))
        scratch_shapes = []
        semantics = ("parallel", "parallel")
        need_bytes = fullbatch_bytes
    else:
        if tile_b is not None:
            tb = max(8, _round_up(int(tile_b), 8))
        else:
            tb = (_aligned_divisor(b_pad, 512, 256)
                  or _aligned_divisor(b_pad, 512, 128)
                  or min(512, _round_up(b_pad, 256)))
        b_tiled = _round_up(b_pad, tb)
        if b_tiled != b_pad:
            z1 = jnp.pad(z1, ((0, b_tiled - b_pad), (0, 0)))
            z2 = jnp.pad(z2, ((0, b_tiled - b_pad), (0, 0)))
        nk = b_tiled // tb

        kernel = _make_batchtiled_kernel(c_all, c_dsq, c_d)
        grid = (ni, ni, nk)
        in_specs = [
            pl.BlockSpec((tb, td), lambda i, j, k: (k, i)),
            pl.BlockSpec((tb, td), lambda i, j, k: (k, j)),
        ]
        out_specs = pl.BlockSpec((8, 128), lambda i, j, k: (i, j))
        scratch_shapes = [pltpu.VMEM((td, td), jnp.float32)]
        semantics = ("parallel", "parallel", "arbitrary")
        need_bytes = 2 * 2 * tb * td * itemsize + td * td * 4

    # Raise the scoped VMEM limit explicitly (defaults: 16 MiB v5e, 32 MiB
    # v6e/v7x) with headroom over the estimated footprint.
    vmem_limit = int(min(128 * 1024 * 1024,
                         max(32 * 1024 * 1024, int(need_bytes * 1.5) + (2 << 20))))

    out = pl.pallas_call(
        kernel,
        out_shape=jax.ShapeDtypeStruct((ni * 8, ni * 128), jnp.float32),
        grid_spec=pltpu.PrefetchScalarGridSpec(
            num_scalar_prefetch=0,
            grid=grid,
            in_specs=in_specs,
            out_specs=out_specs,
            scratch_shapes=scratch_shapes,
        ),
        compiler_params=pltpu.CompilerParams(
            dimension_semantics=semantics,
            vmem_limit_bytes=vmem_limit),
    )(z1, z2)

    # Each (i, j) tile's partial is replicated over its (8, 128) output block;
    # pick one representative per block, reduce, and add the constant D term.
    partials = out[0::8, 0::128]
    return jnp.sum(partials) + jnp.float32(d)


def _reference_loss(z1, z2, lambda_param: float = 0.005):
    """Pure-JAX reference mirroring the PyTorch module exactly."""
    bsz, d = z1.shape
    z1f = z1.astype(jnp.float32)
    z2f = z2.astype(jnp.float32)
    c = jnp.matmul(z1f.T, z2f, precision=lax.Precision.HIGHEST) / bsz
    on_diag = jnp.sum((jnp.diagonal(c) - 1.0) ** 2)
    mask = ~jnp.eye(d, dtype=bool)
    off_diag = jnp.sum(jnp.where(mask, c, 0.0) ** 2)
    return on_diag + lambda_param * off_diag


if __name__ == "__main__":
    key = jax.random.PRNGKey(0)
    k1, k2 = jax.random.split(key)
    B, D = 64, 512
    z1 = jax.random.normal(k1, (B, D), dtype=jnp.float32)
    z2 = jax.random.normal(k2, (B, D), dtype=jnp.float32)
    lam = 0.005  # config.get('lambda', 0.005)

    ref_f32 = jax.block_until_ready(_reference_loss(z1, z2, lam))
    # Apples-to-apples reference for the bf16 MXU feed.
    z1_bf = z1.astype(jnp.bfloat16).astype(jnp.float32)
    z2_bf = z2.astype(jnp.bfloat16).astype(jnp.float32)
    ref_bf16 = jax.block_until_ready(_reference_loss(z1_bf, z2_bf, lam))

    # 1) Default path: bf16 operands, full-batch blocks (no k axis),
    #    2x2 feature tiles (both parallel axes >= 2).
    loss_bf16 = jax.block_until_ready(barlow_twins_loss(z1, z2, lam))
    assert jnp.allclose(loss_bf16, ref_bf16, rtol=1e-4, atol=1e-3), (loss_bf16, ref_bf16)
    assert jnp.allclose(loss_bf16, ref_f32, rtol=2e-2, atol=2e-2), (loss_bf16, ref_f32)

    # 2) Exact-dtype path (f32 on the MXU), full-batch blocks.
    loss_f32 = jax.block_until_ready(
        barlow_twins_loss(z1, z2, lam, compute_dtype=None))
    assert jnp.allclose(loss_f32, ref_f32, rtol=1e-4, atol=1e-4), (loss_f32, ref_f32)

    # 3) Forced batch-tiled fallback: exercises the k-axis accumulator,
    #    diagonal vs off-diagonal tiles and the finalize epilogue.
    loss_kt = jax.block_until_ready(
        barlow_twins_loss(z1, z2, lam, compute_dtype=None,
                          tile_d=256, tile_b=32))
    assert jnp.allclose(loss_kt, ref_f32, rtol=1e-4, atol=1e-4), (loss_kt, ref_f32)

    # 4) Non-aligned shapes: exercises zero-padding of both B and D.
    B2, D2 = 50, 200
    z1o = jax.random.normal(jax.random.PRNGKey(3), (B2, D2), dtype=jnp.float32)
    z2o = jax.random.normal(jax.random.PRNGKey(4), (B2, D2), dtype=jnp.float32)
    ref_o = jax.block_until_ready(_reference_loss(z1o, z2o, lam))
    loss_o = jax.block_until_ready(
        barlow_twins_loss(z1o, z2o, lam, compute_dtype=None))
    assert jnp.allclose(loss_o, ref_o, rtol=1e-4, atol=1e-4), (loss_o, ref_o)

    print("KERNEL_OK")
</pallas_src>

<mosaic_0001>
module attributes {stable_mosaic.version = 11 : i64} {
  func.func @kernel(%arg0: i32, %arg1: i32, %arg2: memref<64x256xbf16, #tpu.memory_space<vmem>>, %arg3: memref<64x256xbf16, #tpu.memory_space<vmem>>, %arg4: memref<8x128xf32, #tpu.memory_space<vmem>>) attributes {dimension_semantics = [#tpu.dimension_semantics<parallel>, #tpu.dimension_semantics<parallel>], iteration_bounds = array<i64: 2, 2>, scalar_prefetch = 0 : i64, scratch_operands = 0 : i64, tpu.core_type = #tpu.core_type<tc>, window_params = [{transform_indices = @transform_0, window_bounds = array<i64: 64, 256>}, {transform_indices = @transform_1, window_bounds = array<i64: 64, 256>}, {transform_indices = @transform_2, window_bounds = array<i64: 8, 128>}]} {
    %c0 = arith.constant 0 : index
    %c0_0 = arith.constant 0 : index
    %0 = vector.load %arg2[%c0, %c0_0] : memref<64x256xbf16, #tpu.memory_space<vmem>>, vector<64x256xbf16>
    %c0_1 = arith.constant 0 : index
    %c0_2 = arith.constant 0 : index
    %1 = vector.load %arg3[%c0_1, %c0_2] : memref<64x256xbf16, #tpu.memory_space<vmem>>, vector<64x256xbf16>
    %cst = arith.constant dense<0.000000e+00> : vector<256x256xf32>
    %2 = tpu.matmul %0, %1, %cst {dimension_numbers = #tpu.dot_dimension_numbers<[0], [0], [1], [1], [0, 1, 1, 1], [], []>} : vector<64x256xbf16>, vector<64x256xbf16>, vector<256x256xf32> -> vector<256x256xf32>
    %3 = arith.mulf %2, %2 : vector<256x256xf32>
    %4 = vector.shape_cast %3 : vector<256x256xf32> to vector<1x256x256xf32>
    %cst_3 = arith.constant dense<0.000000e+00> : vector<1xf32>
    %5 = vector.multi_reduction <add>, %4, %cst_3 [1, 2] : vector<1x256x256xf32> to vector<1xf32>
    %6 = vector.shape_cast %5 : vector<1xf32> to vector<1x1x1xf32>
    %7 = vector.extract %6[0, 0, 0] : f32 from vector<1x1x1xf32>
    %cst_4 = arith.constant 1.2207031E-6 : f32
    %8 = arith.mulf %cst_4, %7 : f32
    %9 = vector.broadcast %8 : f32 to vector<8x128xf32>
    %c0_5 = arith.constant 0 : index
    %c0_6 = arith.constant 0 : index
    %10 = vector.load %arg4[%c0_5, %c0_6] : memref<8x128xf32, #tpu.memory_space<vmem>>, vector<8x128xf32>
    tpu.vector_store %arg4[%c0_5, %c0_6], %9 {strides = array<i32>} : memref<8x128xf32, #tpu.memory_space<vmem>>, vector<8x128xf32>,
    %11 = arith.cmpi eq, %arg0, %arg1 : i32
    %12 = arith.extui %11 : i1 to i32
    %c0_i32 = arith.constant 0 : i32
    %13 = arith.cmpi ne, %12, %c0_i32 : i32
    scf.if %13 {
      %c0_7 = arith.constant 0 : index
      %c0_8 = arith.constant 0 : index
      %14 = vector.load %arg2[%c0_7, %c0_8] : memref<64x256xbf16, #tpu.memory_space<vmem>>, vector<64x256xbf16>
      %15 = arith.extf %14 : vector<64x256xbf16> to vector<64x256xf32>
      %c0_9 = arith.constant 0 : index
      %c0_10 = arith.constant 0 : index
      %16 = vector.load %arg3[%c0_9, %c0_10] : memref<64x256xbf16, #tpu.memory_space<vmem>>, vector<64x256xbf16>
      %17 = arith.extf %16 : vector<64x256xbf16> to vector<64x256xf32>
      %18 = arith.mulf %15, %17 : vector<64x256xf32>
      %cst_11 = arith.constant dense<0.000000e+00> : vector<256xf32>
      %19 = vector.multi_reduction <add>, %18, %cst_11 [0] : vector<64x256xf32> to vector<256xf32>
      %20 = vector.shape_cast %19 : vector<256xf32> to vector<1x256xf32>
      %cst_12 = arith.constant 2.42919923E-4 : f32
      %21 = vector.broadcast %cst_12 : f32 to vector<1x256xf32>
      %22 = arith.mulf %21, %20 : vector<1x256xf32>
      %23 = arith.mulf %22, %20 : vector<1x256xf32>
      %cst_13 = arith.constant -3.125000e-02 : f32
      %24 = vector.broadcast %cst_13 : f32 to vector<1x256xf32>
      %25 = arith.mulf %24, %20 : vector<1x256xf32>
      %26 = arith.addf %23, %25 : vector<1x256xf32>
      %27 = vector.shape_cast %26 : vector<1x256xf32> to vector<1x1x256xf32>
      %cst_14 = arith.constant dense<0.000000e+00> : vector<1xf32>
      %28 = vector.multi_reduction <add>, %27, %cst_14 [1, 2] : vector<1x1x256xf32> to vector<1xf32>
      %29 = vector.shape_cast %28 : vector<1xf32> to vector<1x1x1xf32>
      %30 = vector.extract %29[0, 0, 0] : f32 from vector<1x1x1xf32>
      %c0_15 = arith.constant 0 : index
      %c0_16 = arith.constant 0 : index
      %31 = vector.load %arg4[%c0_15, %c0_16] : memref<8x128xf32, #tpu.memory_space<vmem>>, vector<8x128xf32>
      %32 = vector.broadcast %30 : f32 to vector<8x128xf32>
      %33 = arith.addf %31, %32 : vector<8x128xf32>
      %c0_17 = arith.constant 0 : index
      %c0_18 = arith.constant 0 : index
      %34 = vector.load %arg4[%c0_17, %c0_18] : memref<8x128xf32, #tpu.memory_space<vmem>>, vector<8x128xf32>
      tpu.vector_store %arg4[%c0_17, %c0_18], %33 {strides = array<i32>} : memref<8x128xf32, #tpu.memory_space<vmem>>, vector<8x128xf32>,
    } else {
    }
    return
  }
  func.func @transform_0(%arg0: i32, %arg1: i32) -> (i32, i32) {
    %c0_i32 = arith.constant 0 : i32
    %c0_i32_0 = arith.constant 0 : i32
    return %c0_i32, %arg0 : i32, i32
  }
  func.func @transform_1(%arg0: i32, %arg1: i32) -> (i32, i32) {
    %c0_i32 = arith.constant 0 : i32
    %c0_i32_0 = arith.constant 0 : i32
    return %c0_i32, %arg1 : i32, i32
  }
  func.func @transform_2(%arg0: i32, %arg1: i32) -> (i32, i32) {
    %c0_i32 = arith.constant 0 : i32
    return %arg0, %arg1 : i32, i32
  }
}

</mosaic_0001>

<bundles_post_ra>
// kernel: tpu_custom_call.1
= control target key start
LH: loop header
LB: loop body
LE: loop exit
PB: predicated region body
PF: predicated region fallthrough
CT: control target
= control target key end

     0   :  { %s1871_s0 = inlined_call_operand.hbm [shape: bf16[64,512], index: 0, kind: input, shape index: {}]   ;;  %s1872_s1 = inlined_call_operand.hbm [shape: bf16[64,512], index: 1, kind: input, shape index: {}]   ;;  %s1873_s2 = inlined_call_operand.hbm [shape: f32[16,256], index: 2, kind: output, shape index: {}]  }
   0x1   :  { %1882 = sst [smem:[#allocation17_spill]] %s1871_s0 }
   0x2   :  { %1883 = sst [smem:[#allocation18_spill]] %s1873_s2 }
   0x3   :  { %7 = vsyncpa [#allocation3], 0 }
   0x4   :  { %9 = vsyncpa [#allocation3 + $0x1], 0 }
   0x5   :  { %10 = vsyncpa [#allocation6], 0 }
   0x6   :  { %12 = vsyncpa [#allocation6 + $0x1], 0 }
   0x7   :  { %13 = vsyncpa [#allocation4], 0 }
   0x8   :  { %15 = vsyncpa [#allocation4 + $0x1], 0  ;;  %s1463_s9 = smov 0   ;;  %s1465_s10 = smov 0  }
   0x9   :  { %s1467_s11 = smov 0   ;;  %s1469_s12 = smov 0  }
   0xa   :  { %s1471_s13 = smov 0   ;;  %s1473_s14 = smov 0  }
   0xb   :  { %s1475_s15 = smov 0   ;;  %s1477_s16 = smov 0  }
   0xc   :  { %s1479_s17 = smov 0   ;;  %s1481_s18 = smov 0  }
   0xd   :  { %s1483_s19 = smov 0   ;;  %s1485_s20 = smov 0  }
   0xe   :  { %s1487_s21 = smov 0   ;;  %s1489_s22 = smov 0  }
   0xf LB: > { %1884 = sst [smem:[#allocation11_spill]] %s1435_s20  ;;  %s952_s23 = sadd.s32 4294967295, %s1443_s22   ;;  %s1443_s22 = sphi %s1489_s22, %s21_s22   ;;  %s1439_s21 = sphi %s1487_s21, %s1919_s21   ;;  %s1435_s20 = sphi %s1485_s20, %s1908_s20   ;;  %s1431_s19 = sphi %s1483_s19, %s1907_s19   ;;  %s1427_s18 = sphi %s1481_s18, %s1906_s18   ;;  %s1423_s17 = sphi %s1479_s17, %s1918_s17   ;;  %s1419_s16 = sphi %s1477_s16, %s1917_s16   ;;  %s1415_s15 = sphi %s1475_s15, %s1916_s15   ;;  %s1411_s14 = sphi %s1473_s14, %s1915_s14   ;;  %s1407_s13 = sphi %s1471_s13, %s1914_s13   ;;  %s1403_s12 = sphi %s1469_s12, %s1913_s12   ;;  %s1399_s11 = sphi %s1467_s11, %s1912_s11   ;;  %s1395_s10 = sphi %s1465_s10, %s1911_s10   ;;  %s1391_s9 = sphi %s1463_s9, %s1910_s9  }
  0x10   : > { %1885 = sst [smem:[#allocation12_spill]] %s1439_s21  ;;  %s33_s24 = sadd.s32 1, %s1439_s21 }
  0x11   : > { %s40_s25 = sadd.s32 1, %s1423_s17  ;;  %p47_p0 = scmp.ne.s32.totalorder %s1423_s17, %s1419_s16 }
  0x12   : > { %p48_p1 = scmp.eq.s32.totalorder %s1443_s22, 0  ;;  %p53_p2 = scmp.ne.s32.totalorder %s1419_s16, %s1415_s15 }
  0x13   : > { %p1538_p3 = scmp.eq.s32.totalorder %s952_s23, 0  ;;  %p1542_p4 = scmp.eq.s32.totalorder %s952_s23, 3 }
  0x14   : > { %p49_p5 = por %p48_p1, %p47_p0  ;;  %p1115_p7 = scmp.lt.s32.totalorder %s1443_s22, 4 }
  0x15   : > { %p1550_p6 = por %p1538_p3, %p53_p2  ;;  %s131_s29 = sand.u32 1, %s1423_s17  }
  0x16   : > { %s1068_s30 = sshll.u32 %s1439_s21, 3  ;;  %s956_s3 = sshll.u32 %s131_s29, 6 }
  0x17   : > { %s1889_s0 = sld [smem:[#allocation17_spill]]  ;;  %s135_s8 = scalar_lea.vmem [#allocation2], %s956_s3 }
  0x18   : > { %s143_s15 = sshll.u32 %s135_s8, 4  ;;  %p1105_p8 = pnand %p1115_p7, %p49_p5  ;;  %s144_s15 = int_to_ptr.vmem [resolvable:$true] %s143_s15 }
  0x19   : > { %p962_p9 = scmp.ge.s32.totalorder %s1443_s22, 1  ;;  %s132_s23 = scalar_lea.sflag [#allocation3], %s131_s29 }
  0x1a   : > { %s1875_s4 = smov 128   ;;  %s1876_s5 = smov 8  }
  0x1b   : > { %p173_p10 = scmp.lt.s32.totalorder %s1443_s22, 5  ;;  %s30_s8 = sadd.s32 1, %s1435_s20 }
  0x1c   : > { %p31_p12 = scmp.ge.s32.totalorder %s30_s8, 2  ;;  %s66_s29 = sadd.s32 1, %s1411_s14 }
  0x1d   : > { %s140_s6 = scalar_lea.hbm %s1889_s0, %s1068_s30  ;;  %s1874_s30 = smov 256  }
  0x1e   : > { %s141_s7 = sshll.u32 %s140_s6, 4  ;;  %p1567_p11 = pnand %p962_p9, %p173_p10  ;;  %s142_s7 = int_to_ptr.hbm [resolvable:$true] %s141_s7 }
  0x1f   : > { %1107 = dma.hbm_to_vmem [thread:$0]  (!%p1105_p8), %s142_s7, 1024, %s144_s15, %s132_s23, %s1874_s30, %s1875_s4, %s1876_s5  }
  0x20   : > { %s953_s6 = sadd.s32 4294967294, %s1443_s22   ;;  %p73_p13 = scmp.ne.s32.totalorder %s1411_s14, %s1407_s13 }
  0x21   : > { %p79_p0 = scmp.ne.s32.totalorder %s1407_s13, %s1403_s12  ;;  %s1921_s8 = smov (%p31_p12, %s30_s8), 0 }
  0x22   : > { %1891 = sst [smem:[#allocation13_spill]] %s1921_s8  ;;  %s1923_s24 = smov (!%p31_p12, %s33_s24), %s1439_s21 }
  0x23   : > { %s63_s7 = ssub.s32 %s1435_s20, %s1921_s8  ;;  %p1587_p2 = por %p73_p13, %p48_p1 }
  0x24   : > { %p35_p5 = scmp.ge.s32.totalorder %s1923_s24, 2  ;;  %p64_p8 = scmp.eq.s32.totalorder %s63_s7, 0 }
  0x25   : > { %p1593_p9 = por %p79_p0, %p1538_p3  ;;  %s94_s23 = sadd.s32 1, %s1399_s11 }
  0x26   : > { %s1925_s24 = smov (%p35_p5, %s1923_s24), 0  ;;  %p104_p1 = scmp.ne.s32.totalorder %s1399_s11, %s1395_s10 }
  0x27   : > { %1894 = sst [smem:[#allocation14_spill]] %s1925_s24  ;;  %s37_s4 = ssub.s32 %s1439_s21, %s1925_s24 }
  0x28   : > { %s1601_s30 = scalar_select %p64_p8, %s1411_s14, %s66_s29  }
  0x29   : > { %p38_p10 = scmp.eq.s32.totalorder %s37_s4, 0  ;;  %s91_s5 = sor.u32 %s63_s7, %s37_s4 }
  0x2a   : > { %1895 = sst [smem:[#allocation15_spill]] %s1601_s30  ;;  %p92_p12 = scmp.eq.s32.totalorder %s91_s5, 0 }
  0x2b   : > { %p1609_p13 = por %p1542_p4, %p104_p1  ;;  %p110_p3 = scmp.ne.s32.totalorder %s1395_s10, %s1391_s9 }
  0x2c   : > { %s1616_s0 = scalar_select %p38_p10, %s1423_s17, %s40_s25  }
  0x2d   : > { %s1619_s8 = scalar_select %p92_p12, %s1399_s11, %s94_s23  }
  0x2e   : > { %1897 = sst [smem:[#allocation16_spill]] %s1616_s0  ;;  %p111_p0 = scmp.eq.s32.totalorder %s953_s6, 3 }
  0x2f   : > { %s153_s29 = sand.u32 1, %s1411_s14   ;;  %s1069_s24 = sshll.u32 %s1435_s20, 3 }
  0x30   : > { %p1625_p5 = por %p111_p0, %p110_p3  ;;  %s959_s27 = sshll.u32 %s153_s29, 6 }
  0x31   : > { %s162_s7 = scalar_lea.hbm %s1872_s1, %s1069_s24  ;;  %s157_s2 = scalar_lea.vmem [#allocation5], %s959_s27 }
  0x32   : > { %s163_s30 = sshll.u32 %s162_s7, 4  ;;  %s165_s25 = sshll.u32 %s157_s2, 4  ;;  %s164_s30 = int_to_ptr.hbm [resolvable:$true] %s163_s30  ;;  %s166_s25 = int_to_ptr.vmem [resolvable:$true] %s165_s25 }
  0x33   : > { %p1108_p4 = pnand %p1115_p7, %p1587_p2  ;;  %s154_s6 = scalar_lea.sflag [#allocation6], %s153_s29 }
  0x34   : > { %s1899_s23 = smov 8   ;;  %s1900_s20 = smov 128  }
  0x35   : > { %s1901_s0 = smov 256   ;;  %177 = sbr.rel (%p1567_p11) target bundleno = 985 (0x3d9), region = 28 }
  0x36   : > { %1110 = dma.hbm_to_vmem [thread:$0]  (!%p1108_p4), %s164_s30, 1024, %s166_s25, %s154_s6, %s1901_s0, %s1900_s20, %s1899_s23  }
  0x37   : > { %s179_s4 = sand.u32 (!%p1567_p11), 1, %s1419_s16  }
  0x38   : > { %s963_s24 = sshll.u32 (!%p1567_p11), %s179_s4, 6  ;;  %s180_s5 = scalar_lea.sflag (!%p1567_p11), [#allocation3], %s179_s4 }
  0x39   : > { %s1642_s7 = scalar_lea.vmem (!%p1567_p11), [#allocation2], %s963_s24 }
  0x3a   : > { %1378 = dma.done.wait (%p1550_p6), %s180_s5, 1024  }
  0x3b   : > { %1380 = vsyncadd (%p1550_p6), %s180_s5, 4294966272  ;;  %s189_s2 = sand.u32 1, %s1407_s13  }
  0x3c   : > { %s964_s15 = sshll.u32 %s189_s2, 6  ;;  %s190_s0 = scalar_lea.sflag [#allocation6], %s189_s2 }
  0x3d   : > { %s1649_s20 = scalar_lea.vmem [#allocation5], %s964_s15 }
  0x3e   : > { %1382 = dma.done.wait (%p1593_p9), %s190_s0, 1024  }
  0x3f   : > { %1384 = vsyncadd (%p1593_p9), %s190_s0, 4294966272  ;;  %v1070_v0 = vld [vmem:[%s1642_s7 + $0x4] sm:$0xf]  ;;  %v968_v1 = vld [vmem:[%s1642_s7] sm:$0xf]  ;;  %vm343_vm0 = vcmask 523264   ;;  %p1062_p6 = scmp.ne.s32.totalorder %s1431_s19, %s1427_s18 }
  0x40   : > { %v970_v2 = vld [vmem:[%s1642_s7 + $0x8] sm:$0xf0]  ;;  %v1071_v3 = vld [vmem:[%s1642_s7 + $0x4] sm:$0xf0]  ;;  %v1072_v6 = vld [vmem:[%s1642_s7 + $0x14] sm:$0xf] }
  0x41   : > { %v973_v4 = vor.u32 %v1070_v0, %v970_v2  ;;  %v969_v5 = vor.u32 %v1071_v3, %v968_v1  ;;  %v976_v7 = vld [vmem:[%s1642_s7 + $0x10] sm:$0xf]  ;;  %v978_v8 = vld [vmem:[%s1642_s7 + $0x18] sm:$0xf0]  ;;  %v1073_v9 = vld [vmem:[%s1642_s7 + $0x14] sm:$0xf0] }
  0x42   : > { %v977_v10 = vor.u32 %v1073_v9, %v976_v7  ;;  %v981_v11 = vor.u32 %v1072_v6, %v978_v8  ;;  %v1024_v12 = vld [vmem:[%s1649_s20 + $0x30] sm:$0xf]  ;;  %v1085_v13 = vld [vmem:[%s1649_s20 + $0x34] sm:$0xf0]  ;;  %v1084_v14 = vld [vmem:[%s1649_s20 + $0x34] sm:$0xf] }
  0x43   : > { %279 = vxpose.binary.xlu0.c.b16.start [1/8] (short) %v973_v4, %v969_v5, 128  ;;  %v1025_v15 = vor.u32 %v1085_v13, %v1024_v12  ;;  %v1026_v16 = vld [vmem:[%s1649_s20 + $0x38] sm:$0xf0]  ;;  %v1016_v17 = vld [vmem:[%s1649_s20 + $0x20] sm:$0xf]  ;;  %v1083_v18 = vld [vmem:[%s1649_s20 + $0x24] sm:$0xf0] }
  0x44   : > { %v1029_v19 = vor.u32 %v1084_v14, %v1026_v16  ;;  %v1082_v20 = vld [vmem:[%s1649_s20 + $0x24] sm:$0xf]  ;;  %v1018_v21 = vld [vmem:[%s1649_s20 + $0x28] sm:$0xf0]  ;;  %v1017_v22 = vor.u32 %v1083_v18, %v1016_v17  ;;  %v1008_v24 = vld [vmem:[%s1649_s20 + $0x10] sm:$0xf] }
  0x45   : > { %396 = vmatpush.bf16.msra.mxu0 %v1025_v15  ;;  %1086 = vmatpush.bf16.msra.mxu2 %v1025_v15  ;;  %v1021_v23 = vor.u32 %v1082_v20, %v1018_v21  ;;  %v1081_v25 = vld [vmem:[%s1649_s20 + $0x14] sm:$0xf0]  ;;  %v1080_v26 = vld [vmem:[%s1649_s20 + $0x14] sm:$0xf]  ;;  %v1010_v27 = vld [vmem:[%s1649_s20 + $0x18] sm:$0xf0] }
  0x46   : > { %485 = vmatpush.bf16.msra.mxu1 %v1029_v19  ;;  %1090 = vmatpush.bf16.msra.mxu3 %v1029_v19  ;;  %v1009_v28 = vor.u32 %v1081_v25, %v1008_v24  ;;  %v1074_v29 = vld [vmem:[%s1642_s7 + $0x24] sm:$0xf]  ;;  %v1013_v30 = vor.u32 %v1080_v26, %v1010_v27  ;;  %v1000_v31 = vld [vmem:[%s1649_s20] sm:$0xf]  ;;  %v1079_v32 = vld [vmem:[%s1649_s20 + $0x4] sm:$0xf0] }
  0x47   : > { %v984_v33 = vld [vmem:[%s1642_s7 + $0x20] sm:$0xf]  ;;  %v986_v34 = vld [vmem:[%s1642_s7 + $0x28] sm:$0xf0]  ;;  %v1075_v35 = vld [vmem:[%s1642_s7 + $0x24] sm:$0xf0]  ;;  %v1001_v38 = vor.u32 %v1079_v32, %v1000_v31 }
  0x48   : > { %v1078_v36 = vld [vmem:[%s1649_s20 + $0x4] sm:$0xf]  ;;  %v1002_v37 = vld [vmem:[%s1649_s20 + $0x8] sm:$0xf0]  ;;  %v985_v39 = vor.u32 %v1075_v35, %v984_v33  ;;  %v989_v40 = vor.u32 %v1074_v29, %v986_v34  ;;  %v1076_v42 = vld [vmem:[%s1642_s7 + $0x34] sm:$0xf] }
  0x49   : > { %397 = vmatpush.bf16.msra.mxu0 %v1017_v22  ;;  %1087 = vmatpush.bf16.msra.mxu2 %v1017_v22  ;;  %v1005_v41 = vor.u32 %v1078_v36, %v1002_v37  ;;  %v992_v43 = vld [vmem:[%s1642_s7 + $0x30] sm:$0xf]  ;;  %v994_v44 = vld [vmem:[%s1642_s7 + $0x38] sm:$0xf0]  ;;  %v1077_v45 = vld [vmem:[%s1642_s7 + $0x34] sm:$0xf0] }
  0x4a   : > { %486 = vmatpush.bf16.msra.mxu1 %v1021_v23  ;;  %1091 = vmatpush.bf16.msra.mxu3 %v1021_v23  ;;  %v993_v46 = vor.u32 %v1077_v45, %v992_v43  ;;  %v997_v47 = vor.u32 %v1076_v42, %v994_v44  ;;  %s217_s28 = sand.u32 1, %s1395_s10  }
  0x4b   : > { %s965_s30 = sshll.u32 %s217_s28, 3 }
  0x4c   : > { %s1778_s29 = scalar_lea.vmem [#allocation7], %s965_s30 }
  0x4d   : > { %398 = vmatpush.bf16.msra.mxu0 %v1009_v28  ;;  %1088 = vmatpush.bf16.msra.mxu2 %v1009_v28 }
  0x4e   : > { %487 = vmatpush.bf16.msra.mxu1 %v1013_v30  ;;  %1092 = vmatpush.bf16.msra.mxu3 %v1013_v30 }
  0x51   : > { %399 = vmatpush.bf16.msra.mxu0 %v1001_v38  ;;  %1089 = vmatpush.bf16.msra.mxu2 %v1001_v38 }
  0x52   : > { %488 = vmatpush.bf16.msra.mxu1 %v1005_v41  ;;  %1093 = vmatpush.bf16.msra.mxu3 %v1005_v41 }
  0x53   : > { %280 = vxpose.binary.xlu0.c.b16.cont [2/8] (short) %v981_v11, %v977_v10, 128 }
  0x63   : > { %281 = vxpose.binary.xlu0.c.b16.cont [3/8] (short) %v989_v40, %v985_v39, 128 }
  0x73   : > { %282 = vxpose.binary.xlu0.c.b16.end [4/8] (short) %v997_v47, %v993_v46, 128 }
  0xef   : > { %v287_v48 = vpop.trf.xlu0 }
  0xf0   : > { %1030 = vmatmul.msk.bf16.vlgmr.msra.gmra.mxu0 %vm343_vm0, %v287_v48  ;;  %1046 = vmatmul.msk.bf16.vlgmr.msra.gmra.mxu1 %vm343_vm0, %v287_v48 }
  0xf7   : > { %v288_v49 = vpop.trf.xlu0 }
  0xf8   : > { %1038 = vmatmul.msk.bf16.vlgmr.msra.gmra.mxu2 %vm343_vm0, %v288_v49  ;;  %1054 = vmatmul.msk.bf16.vlgmr.msra.gmra.mxu3 %vm343_vm0, %v288_v49 }
  0xff   : > { %v289_v50 = vpop.trf.xlu0 }
 0x100   : > { %1031 = vmatmul.msk.bf16.gmra.mxu0 %vm343_vm0, %v289_v50  ;;  %1047 = vmatmul.msk.bf16.gmra.mxu1 %vm343_vm0, %v289_v50 }
 0x107   : > { %v290_v51 = vpop.trf.xlu0 }
 0x108   : > { %1039 = vmatmul.msk.bf16.gmra.mxu2 %vm343_vm0, %v290_v51  ;;  %1055 = vmatmul.msk.bf16.gmra.mxu3 %vm343_vm0, %v290_v51 }
 0x10f   : > { %v291_v52 = vpop.trf.xlu0 }
 0x110   : > { %1032 = vmatmul.msk.bf16.gmra.mxu0 %vm343_vm0, %v291_v52  ;;  %1048 = vmatmul.msk.bf16.gmra.mxu1 %vm343_vm0, %v291_v52 }
 0x117   : > { %v292_v53 = vpop.trf.xlu0 }
 0x118   : > { %1040 = vmatmul.msk.bf16.gmra.mxu2 %vm343_vm0, %v292_v53  ;;  %1056 = vmatmul.msk.bf16.gmra.mxu3 %vm343_vm0, %v292_v53 }
 0x11f   : > { %v293_v54 = vpop.trf.xlu0 }
 0x120   : > { %1033 = vmatmul.msk.bf16.gmra.mxu0 %vm343_vm0, %v293_v54  ;;  %1049 = vmatmul.msk.bf16.gmra.mxu1 %vm343_vm0, %v293_v54 }
 0x127   : > { %v294_v55 = vpop.trf.xlu0 }
 0x128   : > { %1041 = vmatmul.msk.bf16.gmra.mxu2 %vm343_vm0, %v294_v55  ;;  %1057 = vmatmul.msk.bf16.gmra.mxu3 %vm343_vm0, %v294_v55 }
 0x12f   : > { %v295_v56 = vpop.trf.xlu0 }
 0x130   : > { %1034 = vmatmul.msk.bf16.gmra.mxu0 %vm343_vm0, %v295_v56  ;;  %1050 = vmatmul.msk.bf16.gmra.mxu1 %vm343_vm0, %v295_v56 }
 0x137   : > { %v296_v57 = vpop.trf.xlu0 }
 0x138   : > { %1042 = vmatmul.msk.bf16.gmra.mxu2 %vm343_vm0, %v296_v57  ;;  %1058 = vmatmul.msk.bf16.gmra.mxu3 %vm343_vm0, %v296_v57 }
 0x13f   : > { %v297_v58 = vpop.trf.xlu0 }
 0x140   : > { %1035 = vmatmul.msk.bf16.gmra.mxu0 %vm343_vm0, %v297_v58  ;;  %1051 = vmatmul.msk.bf16.gmra.mxu1 %vm343_vm0, %v297_v58 }
 0x147   : > { %v298_v59 = vpop.trf.xlu0 }
 0x148   : > { %1043 = vmatmul.msk.bf16.gmra.mxu2 %vm343_vm0, %v298_v59  ;;  %1059 = vmatmul.msk.bf16.gmra.mxu3 %vm343_vm0, %v298_v59 }
 0x14f   : > { %v299_v60 = vpop.trf.xlu0 }
 0x150   : > { %1036 = vmatmul.msk.bf16.gmra.mxu0 %vm343_vm0, %v299_v60  ;;  %1052 = vmatmul.msk.bf16.gmra.mxu1 %vm343_vm0, %v299_v60 }
 0x157   : > { %v300_v61 = vpop.trf.xlu0 }
 0x158   : > { %1044 = vmatmul.msk.bf16.gmra.mxu2 %vm343_vm0, %v300_v61  ;;  %1060 = vmatmul.msk.bf16.gmra.mxu3 %vm343_vm0, %v300_v61 }
 0x15f   : > { %v301_v62 = vpop.trf.xlu0 }
 0x160   : > { %1037 = vmatmul.msk.bf16.gmra.mxu0 %vm343_vm0, %v301_v62  ;;  %1053 = vmatmul.msk.bf16.gmra.mxu1 %vm343_vm0, %v301_v62 }
 0x167   : > { %v302_v1 = vpop.trf.xlu0 }
 0x168   : > { %1045 = vmatmul.msk.bf16.gmra.mxu2 %vm343_vm0, %v302_v1  ;;  %1061 = vmatmul.msk.bf16.gmra.mxu3 %vm343_vm0, %v302_v1 }
 0x16d   : > { %v401_v63 = vpop.f32.mrf.mxu0  ;;  %v490_v0 = vpop.f32.mrf.mxu1 }
 0x16e   : > { %v570_v10 = vmul.f32 %v401_v63, %v401_v63  ;;  %v571_v11 = vmul.f32 %v490_v0, %v490_v0 }
 0x170   : > { %v634_v15 = vadd.f32 %v571_v11, %v570_v10 }
 0x175   : > { %v403_v2 = vpop.f32.mrf.mxu0  ;;  %v492_v3 = vpop.f32.mrf.mxu1 }
 0x176   : > { %v572_v13 = vmul.f32 %v403_v2, %v403_v2  ;;  %v573_v19 = vmul.f32 %v492_v3, %v492_v3 }
 0x178   : > { %v635_v16 = vadd.f32 %v634_v15, %v572_v13 }
 0x17a   : > { %v636_v21 = vadd.f32 %v635_v16, %v573_v19 }
 0x17b   : > { %v1719_v12 = vpop.f32.mrf.mxu2  ;;  %v1721_v14 = vpop.f32.mrf.mxu3 }
 0x17d   : > { %v406_v4 = vpop.f32.mrf.mxu0  ;;  %v495_v5 = vpop.f32.mrf.mxu1 }
 0x17e   : > { %v574_v20 = vmul.f32 %v406_v4, %v406_v4  ;;  %v575_v25 = vmul.f32 %v495_v5, %v495_v5 }
 0x180   : > { %v637_v23 = vadd.f32 %v636_v21, %v574_v20 }
 0x182   : > { %v638_v29 = vadd.f32 %v637_v23, %v575_v25 }
 0x183   : > { %v1723_v22 = vpop.f32.mrf.mxu2  ;;  %v1725_v24 = vpop.f32.mrf.mxu3 }
 0x185   : > { %v408_v6 = vpop.f32.mrf.mxu0  ;;  %v497_v7 = vpop.f32.mrf.mxu1 }
 0x186   : > { %v576_v26 = vmul.f32 %v408_v6, %v408_v6  ;;  %v577_v31 = vmul.f32 %v497_v7, %v497_v7 }
 0x188   : > { %v639_v30 = vadd.f32 %v638_v29, %v576_v26 }
 0x18a   : > { %v640_v34 = vadd.f32 %v639_v30, %v577_v31 }
 0x18b   : > { %v1727_v32 = vpop.f32.mrf.mxu2  ;;  %v1729_v35 = vpop.f32.mrf.mxu3 }
 0x18d   : > { %v411_v8 = vpop.f32.mrf.mxu0  ;;  %v500_v9 = vpop.f32.mrf.mxu1 }
 0x18e   : > { %v578_v33 = vmul.f32 %v411_v8, %v411_v8  ;;  %v579_v39 = vmul.f32 %v500_v9, %v500_v9 }
 0x190   : > { %v641_v38 = vadd.f32 %v640_v34, %v578_v33 }
 0x192   : > { %v642_v41 = vadd.f32 %v641_v38, %v579_v39 }
 0x193   : > { %v1731_v42 = vpop.f32.mrf.mxu2  ;;  %v1733_v46 = vpop.f32.mrf.mxu3 }
 0x195   : > { %v413_v17 = vpop.f32.mrf.mxu0  ;;  %v502_v18 = vpop.f32.mrf.mxu1 }
 0x196   : > { %v580_v40 = vmul.f32 %v413_v17, %v413_v17  ;;  %v581_v47 = vmul.f32 %v502_v18, %v502_v18 }
 0x198   : > { %v643_v43 = vadd.f32 %v642_v41, %v580_v40 }
 0x19a   : > { %v644_v49 = vadd.f32 %v643_v43, %v581_v47 }
 0x19b   : > { %v1735_v55 = vpop.f32.mrf.mxu2  ;;  %v1737_v57 = vpop.f32.mrf.mxu3 }
 0x19d   : > { %v416_v27 = vpop.f32.mrf.mxu0  ;;  %v505_v28 = vpop.f32.mrf.mxu1 }
 0x19e   : > { %v582_v48 = vmul.f32 %v416_v27, %v416_v27  ;;  %v583_v51 = vmul.f32 %v505_v28, %v505_v28 }
 0x1a0   : > { %v645_v50 = vadd.f32 %v644_v49, %v582_v48 }
 0x1a2   : > { %v646_v56 = vadd.f32 %v645_v50, %v583_v51 }
 0x1a3   : > { %v1739_v1 = vpop.f32.mrf.mxu2  ;;  %v1741_v4 = vpop.f32.mrf.mxu3 }
 0x1a5   : > { %v418_v36 = vpop.f32.mrf.mxu0  ;;  %v507_v37 = vpop.f32.mrf.mxu1 }
 0x1a6   : > { %v584_v52 = vmul.f32 %v418_v36, %v418_v36  ;;  %v585_v59 = vmul.f32 %v507_v37, %v507_v37 }
 0x1a8   : > { %v647_v58 = vadd.f32 %v646_v56, %v584_v52 }
 0x1aa   : > { %v648_v61 = vadd.f32 %v647_v58, %v585_v59  ;;  %v602_v59 = vmul.f32 %v1719_v12, %v1719_v12  ;;  %v607_v12 = vmul.f32 %v1729_v35, %v1729_v35  ;;  %v612_v35 = vmul.f32 %v1739_v1, %v1739_v1 }
 0x1ab   : > { %v1743_v13 = vpop.f32.mrf.mxu2  ;;  %v1745_v16 = vpop.f32.mrf.mxu3 }
 0x1ad   : > { %v421_v44 = vpop.f32.mrf.mxu0  ;;  %v510_v45 = vpop.f32.mrf.mxu1 }
 0x1ae   : > { %v586_v60 = vmul.f32 %v421_v44, %v421_v44  ;;  %v587_v2 = vmul.f32 %v510_v45, %v510_v45 }
 0x1b0   : > { %v649_v0 = vadd.f32 %v648_v61, %v586_v60 }
 0x1b2   : > { %v650_v5 = vadd.f32 %v649_v0, %v587_v2  ;;  %v604_v0 = vmul.f32 %v1723_v22, %v1723_v22  ;;  %v609_v22 = vmul.f32 %v1733_v46, %v1733_v46  ;;  %v614_v46 = vmul.f32 %v1743_v13, %v1743_v13 }
 0x1b3   : > { %v458_v27 = vpop.f32.mrf.mxu2  ;;  %v547_v33 = vpop.f32.mrf.mxu3 }
 0x1b5   : > { %v423_v53 = vpop.f32.mrf.mxu0  ;;  %v512_v54 = vpop.f32.mrf.mxu1 }
 0x1b6   : > { %v588_v3 = vmul.f32 %v423_v53, %v423_v53  ;;  %v589_v9 = vmul.f32 %v512_v54, %v512_v54 }
 0x1b8   : > { %v651_v6 = vadd.f32 %v650_v5, %v588_v3  ;;  %v605_v3 = vmul.f32 %v1725_v24, %v1725_v24  ;;  %v610_v24 = vmul.f32 %v1735_v55, %v1735_v55  ;;  %v615_v55 = vmul.f32 %v1745_v16, %v1745_v16 }
 0x1ba   : > { %v652_v11 = vadd.f32 %v651_v6, %v589_v9  ;;  %v606_v6 = vmul.f32 %v1727_v32, %v1727_v32  ;;  %v611_v32 = vmul.f32 %v1737_v57, %v1737_v57  ;;  %v616_v57 = vmul.f32 %v458_v27, %v458_v27 }
 0x1bb   : > { %v461_v44 = vpop.f32.mrf.mxu2  ;;  %v550_v47 = vpop.f32.mrf.mxu3 }
 0x1bd   : > { %v426_v62 = vpop.f32.mrf.mxu0  ;;  %v515_v63 = vpop.f32.mrf.mxu1 }
 0x1be   : > { %v590_v10 = vmul.f32 %v426_v62, %v426_v62  ;;  %v591_v17 = vmul.f32 %v515_v63, %v515_v63  ;;  %v603_v62 = vmul.f32 %v1721_v14, %v1721_v14  ;;  %v608_v14 = vmul.f32 %v1731_v42, %v1731_v42 }
 0x1bf   : > { %v613_v42 = vmul.f32 %v1741_v4, %v1741_v4 }
 0x1c0   : > { %v653_v15 = vadd.f32 %v652_v11, %v590_v10 }
 0x1c2   : > { %v654_v21 = vadd.f32 %v653_v15, %v591_v17 }
 0x1c3   : > { %v463_v58 = vpop.f32.mrf.mxu2  ;;  %v552_v61 = vpop.f32.mrf.mxu3 }
 0x1c4   : > { %v620_v4 = vmul.f32 %v463_v58, %v463_v58 }
 0x1c5   : > { %v428_v7 = vpop.f32.mrf.mxu0  ;;  %v517_v8 = vpop.f32.mrf.mxu1 }
 0x1c6   : > { %v592_v18 = vmul.f32 %v428_v7, %v428_v7  ;;  %v593_v25 = vmul.f32 %v517_v8, %v517_v8 }
 0x1c8   : > { %v655_v23 = vadd.f32 %v654_v21, %v592_v18 }
 0x1ca   : > { %v656_v28 = vadd.f32 %v655_v23, %v593_v25 }
 0x1cb   : > { %v466_v8 = vpop.f32.mrf.mxu2  ;;  %v555_v10 = vpop.f32.mrf.mxu3 }
 0x1cc   : > { %v623_v16 = vmul.f32 %v555_v10, %v555_v10 }
 0x1cd   : > { %v431_v19 = vpop.f32.mrf.mxu0  ;;  %v520_v20 = vpop.f32.mrf.mxu1 }
 0x1ce   : > { %v594_v26 = vmul.f32 %v431_v19, %v431_v19  ;;  %v595_v34 = vmul.f32 %v520_v20, %v520_v20 }
 0x1d0   : > { %v657_v31 = vadd.f32 %v656_v28, %v594_v26 }
 0x1d2   : > { %v658_v37 = vadd.f32 %v657_v31, %v595_v34  ;;  %v618_v34 = vmul.f32 %v461_v44, %v461_v44 }
 0x1d3   : > { %v468_v19 = vpop.f32.mrf.mxu2  ;;  %v557_v21 = vpop.f32.mrf.mxu3 }
 0x1d4   : > { %v624_v27 = vmul.f32 %v468_v19, %v468_v19 }
 0x1d5   : > { %v433_v29 = vpop.f32.mrf.mxu0  ;;  %v522_v30 = vpop.f32.mrf.mxu1 }
 0x1d6   : > { %v596_v36 = vmul.f32 %v433_v29, %v433_v29  ;;  %v597_v41 = vmul.f32 %v522_v30, %v522_v30  ;;  %v617_v30 = vmul.f32 %v547_v33, %v547_v33 }
 0x1d8   : > { %v659_v38 = vadd.f32 %v658_v37, %v596_v36  ;;  %v619_v37 = vmul.f32 %v550_v47, %v550_v47 }
 0x1da   : > { %v660_v45 = vadd.f32 %v659_v38, %v597_v41 }
 0x1db   : > { %v471_v29 = vpop.f32.mrf.mxu2  ;;  %v560_v1 = vpop.f32.mrf.mxu3 }
 0x1dc   : > { %v627_v47 = vmul.f32 %v560_v1, %v560_v1 }
 0x1dd   : > { %v436_v39 = vpop.f32.mrf.mxu0  ;;  %v525_v40 = vpop.f32.mrf.mxu1 }
 0x1de   : > { %v598_v43 = vmul.f32 %v436_v39, %v436_v39  ;;  %v599_v49 = vmul.f32 %v525_v40, %v525_v40  ;;  %v621_v40 = vmul.f32 %v552_v61, %v552_v61 }
 0x1e0   : > { %v661_v48 = vadd.f32 %v660_v45, %v598_v43  ;;  %v622_v43 = vmul.f32 %v466_v8, %v466_v8 }
 0x1e2   : > { %v662_v52 = vadd.f32 %v661_v48, %v599_v49 }
 0x1e3   : > { %v473_v13 = vpop.f32.mrf.mxu2  ;;  %v562_v48 = vpop.f32.mrf.mxu3 }
 0x1e4   : > { %v628_v58 = vmul.f32 %v473_v13, %v473_v13 }
 0x1e5   : > { %v438_v50 = vpop.f32.mrf.mxu0  ;;  %v527_v51 = vpop.f32.mrf.mxu1 }
 0x1e6   : > { %v600_v53 = vmul.f32 %v438_v50, %v438_v50  ;;  %v601_v56 = vmul.f32 %v527_v51, %v527_v51  ;;  %v625_v51 = vmul.f32 %v557_v21, %v557_v21 }
 0x1e8   : > { %v663_v54 = vadd.f32 %v662_v52, %v600_v53  ;;  %v626_v53 = vmul.f32 %v471_v29, %v471_v29 }
 0x1ea   : > { %v664_v60 = vadd.f32 %v663_v54, %v601_v56 }
 0x1eb   : > { %v476_v52 = vpop.f32.mrf.mxu2  ;;  %v565_v54 = vpop.f32.mrf.mxu3 }
 0x1ec   : > { %v665_v63 = vadd.f32 %v664_v60, %v602_v59  ;;  %v629_v60 = vmul.f32 %v562_v48, %v562_v48 }
 0x1ee   : > { %v666_v2 = vadd.f32 %v665_v63, %v603_v62  ;;  %v630_v62 = vmul.f32 %v476_v52, %v476_v52 }
 0x1f0   : > { %v667_v5 = vadd.f32 %v666_v2, %v604_v0 }
 0x1f2   : > { %v668_v7 = vadd.f32 %v667_v5, %v605_v3  ;;  %v631_v3 = vmul.f32 %v565_v54, %v565_v54 }
 0x1f3   : > { %v478_v0 = vpop.f32.mrf.mxu2  ;;  %v567_v5 = vpop.f32.mrf.mxu3 }
 0x1f4   : > { %v669_v9 = vadd.f32 %v668_v7, %v606_v6  ;;  %v632_v7 = vmul.f32 %v478_v0, %v478_v0 }
 0x1f6   : > { %v670_v11 = vadd.f32 %v669_v9, %v607_v12  ;;  %v633_v12 = vmul.f32 %v567_v5, %v567_v5 }
 0x1f8   : > { %v671_v15 = vadd.f32 %v670_v11, %v608_v14 }
 0x1fa   : > { %v672_v17 = vadd.f32 %v671_v15, %v609_v22 }
 0x1fc   : > { %v673_v18 = vadd.f32 %v672_v17, %v610_v24 }
 0x1fe   : > { %v674_v20 = vadd.f32 %v673_v18, %v611_v32 }
 0x200   : > { %v675_v23 = vadd.f32 %v674_v20, %v612_v35 }
 0x202   : > { %v676_v25 = vadd.f32 %v675_v23, %v613_v42 }
 0x204   : > { %v677_v26 = vadd.f32 %v676_v25, %v614_v46 }
 0x206   : > { %v678_v28 = vadd.f32 %v677_v26, %v615_v55 }
 0x208   : > { %v679_v31 = vadd.f32 %v678_v28, %v616_v57 }
 0x20a   : > { %v680_v36 = vadd.f32 %v679_v31, %v617_v30 }
 0x20c   : > { %v681_v38 = vadd.f32 %v680_v36, %v618_v34 }
 0x20e   : > { %v682_v39 = vadd.f32 %v681_v38, %v619_v37 }
 0x210   : > { %v683_v41 = vadd.f32 %v682_v39, %v620_v4 }
 0x212   : > { %v684_v45 = vadd.f32 %v683_v41, %v621_v40 }
 0x214   : > { %v685_v49 = vadd.f32 %v684_v45, %v622_v43 }
 0x216   : > { %v686_v50 = vadd.f32 %v685_v49, %v623_v16 }
 0x218   : > { %v687_v33 = vadd.f32 %v686_v50, %v624_v27 }
 0x21a   : > { %v688_v44 = vadd.f32 %v687_v33, %v625_v51 }
 0x21c   : > { %v689_v56 = vadd.f32 %v688_v44, %v626_v53 }
 0x21e   : > { %v690_v59 = vadd.f32 %v689_v56, %v627_v47 }
 0x220   : > { %v691_v61 = vadd.f32 %v690_v59, %v628_v58 }
 0x222   : > { %v692_v63 = vadd.f32 %v691_v61, %v629_v60 }
 0x224   : > { %v693_v2 = vadd.f32 %v692_v63, %v630_v62 }
 0x226   : > { %v694_v6 = vadd.f32 %v693_v2, %v631_v3 }
 0x228   : > { %v695_v8 = vadd.f32 %v694_v6, %v632_v7 }
 0x22a   : > { %v696_v9 = vadd.f32 %v695_v8, %v633_v12 }
 0x22c   : > { %697 = vadd.xlane.f32.xlu1 %v696_v9 }
 0x29f   : > { %v698_v10 = vpop.xlane.xlu1 %697 }
 0x2a0   : > { %v699_v14 = vrot.slane %v698_v10, 4 }
 0x2a2   : > { %v700_v11 = vadd.f32 %v699_v14, %v698_v10 }
 0x2a4   : > { %v701_v22 = vrot.slane %v700_v11, 2 }
 0x2a6   : > { %v702_v15 = vadd.f32 %v701_v22, %v700_v11 }
 0x2a8   : > { %v703_v24 = vrot.slane %v702_v15, 1 }
 0x2aa   : > { %v704_v17 = vadd.f32 %v703_v24, %v702_v15 }
 0x2ac   : > { %1094 = vpush %v704_v17 }
 0x2dd   : > { %s1095_s3 = spop %1094  ;;  %712 = sbr.rel (%p1062_p6) target bundleno = 964 (0x3c4), region = 40 }
 0x2de   : > { %s706_s12 = smul.f32 1.2207031e-06, %s1095_s3 }
 0x2e0   : > { %v707_v32 = vstv %s706_s12 }
 0x2e1   : > { %708 = vst [vmem:[%s1778_s29] sm:$0xff] %v707_v32 }
 0x2e2   : > { %v713_v18 = vld [vmem:[%s1642_s7] sm:$0xff]  ;;  %v714_v19 = vld [vmem:[%s1642_s7 + $0x8] sm:$0xff]  ;;  %v715_v21 = vld [vmem:[%s1642_s7 + $0x10] sm:$0xff]  ;;  %vm811_vm1 = vcmask 1040384  }
 0x2e3   : > { %v737_v35 = vld [vmem:[%s1649_s20] sm:$0xff]  ;;  %v738_v20 = vld [vmem:[%s1649_s20 + $0x8] sm:$0xff]  ;;  %v721_v42 = vunpack.c.l.bf16 %v713_v18  ;;  %v722_v23 = vunpack.c.h.bf16 %v713_v18  ;;  %v723_v46 = vunpack.c.l.bf16 %v714_v19  ;;  %v724_v25 = vunpack.c.h.bf16 %v714_v19  ;;  %v739_v55 = vld [vmem:[%s1649_s20 + $0x10] sm:$0xff] }
 0x2e4   : > { %v716_v26 = vld [vmem:[%s1642_s7 + $0x18] sm:$0xff]  ;;  %v745_v28 = vunpack.c.l.bf16 %v737_v35  ;;  %v746_v29 = vunpack.c.h.bf16 %v737_v35  ;;  %v747_v30 = vunpack.c.l.bf16 %v738_v20  ;;  %v748_v31 = vunpack.c.h.bf16 %v738_v20  ;;  %v717_v1 = vld [vmem:[%s1642_s7 + $0x20] sm:$0xff]  ;;  %v718_v43 = vld [vmem:[%s1642_s7 + $0x28] sm:$0xff] }
 0x2e5   : > { %v740_v57 = vld [vmem:[%s1649_s20 + $0x18] sm:$0xff]  ;;  %v725_v34 = vunpack.c.l.bf16 %v715_v21  ;;  %v726_v36 = vunpack.c.h.bf16 %v715_v21  ;;  %v749_v37 = vunpack.c.l.bf16 %v739_v55  ;;  %v750_v38 = vunpack.c.h.bf16 %v739_v55  ;;  %v741_v40 = vld [vmem:[%s1649_s20 + $0x20] sm:$0xff]  ;;  %v742_v45 = vld [vmem:[%s1649_s20 + $0x28] sm:$0xff] }
 0x2e6   : > { %v727_v4 = vunpack.c.l.bf16 %v716_v26  ;;  %v728_v39 = vunpack.c.h.bf16 %v716_v26  ;;  %v751_v41 = vunpack.c.l.bf16 %v740_v57  ;;  %v752_v13 = vunpack.c.h.bf16 %v740_v57  ;;  %v719_v33 = vld [vmem:[%s1642_s7 + $0x30] sm:$0xff]  ;;  %v720_v61 = vld [vmem:[%s1642_s7 + $0x38] sm:$0xff] }
 0x2e7   : > { %v761_v48 = vmul.f32 %v745_v28, %v721_v42  ;;  %v762_v16 = vmul.f32 %v746_v29, %v722_v23  ;;  %v763_v49 = vmul.f32 %v747_v30, %v723_v46  ;;  %v764_v27 = vmul.f32 %v748_v31, %v724_v25  ;;  %v743_v52 = vld [vmem:[%s1649_s20 + $0x30] sm:$0xff]  ;;  %v744_v62 = vld [vmem:[%s1649_s20 + $0x38] sm:$0xff] }
 0x2e8   : > { %v729_v50 = vunpack.c.l.bf16 %v717_v1  ;;  %v730_v51 = vunpack.c.h.bf16 %v717_v1  ;;  %v753_v53 = vunpack.c.l.bf16 %v741_v40  ;;  %v754_v44 = vunpack.c.h.bf16 %v741_v40 }
 0x2e9   : > { %v765_v54 = vmul.f32 %v749_v37, %v725_v34  ;;  %v766_v47 = vmul.f32 %v750_v38, %v726_v36  ;;  %v731_v56 = vunpack.c.l.bf16 %v718_v43  ;;  %v732_v58 = vunpack.c.h.bf16 %v718_v43 }
 0x2ea   : > { %v755_v59 = vunpack.c.l.bf16 %v742_v45  ;;  %v756_v60 = vunpack.c.h.bf16 %v742_v45  ;;  %v767_v63 = vmul.f32 %v751_v41, %v727_v4  ;;  %v768_v0 = vmul.f32 %v752_v13, %v728_v39 }
 0x2eb   : > { %v777_v2 = vadd.f32 %v763_v49, %v761_v48  ;;  %v790_v3 = vadd.f32 %v764_v27, %v762_v16  ;;  %v733_v5 = vunpack.c.l.bf16 %v719_v33  ;;  %v734_v6 = vunpack.c.h.bf16 %v719_v33 }
 0x2ec   : > { %v757_v7 = vunpack.c.l.bf16 %v743_v52  ;;  %v758_v8 = vunpack.c.h.bf16 %v743_v52  ;;  %v769_v12 = vmul.f32 %v753_v53, %v729_v50  ;;  %v770_v9 = vmul.f32 %v754_v44, %v730_v51 }
 0x2ed   : > { %v778_v10 = vadd.f32 %v777_v2, %v765_v54  ;;  %v791_v14 = vadd.f32 %v790_v3, %v766_v47  ;;  %v735_v11 = vunpack.c.l.bf16 %v720_v61  ;;  %v736_v22 = vunpack.c.h.bf16 %v720_v61  ;;  %v824_v61 = vld [vmem:[%s1778_s29] sm:$0xff] }
 0x2ee   : > { %v759_v15 = vunpack.c.l.bf16 %v744_v62  ;;  %v760_v24 = vunpack.c.h.bf16 %v744_v62  ;;  %v771_v17 = vmul.f32 %v755_v59, %v731_v56  ;;  %v772_v32 = vmul.f32 %v756_v60, %v732_v58 }
 0x2ef   : > { %v779_v18 = vadd.f32 %v778_v10, %v767_v63  ;;  %v792_v19 = vadd.f32 %v791_v14, %v768_v0  ;;  %v773_v35 = vmul.f32 %v757_v7, %v733_v5  ;;  %v774_v20 = vmul.f32 %v758_v8, %v734_v6 }
 0x2f0   : > { %v775_v23 = vmul.f32 %v759_v15, %v735_v11  ;;  %v776_v46 = vmul.f32 %v760_v24, %v736_v22 }
 0x2f1   : > { %v780_v21 = vadd.f32 %v779_v18, %v769_v12  ;;  %v793_v42 = vadd.f32 %v792_v19, %v770_v9 }
 0x2f3   : > { %v781_v25 = vadd.f32 %v780_v21, %v771_v17  ;;  %v794_v55 = vadd.f32 %v793_v42, %v772_v32 }
 0x2f5   : > { %v782_v26 = vadd.f32 %v781_v25, %v773_v35  ;;  %v795_v57 = vadd.f32 %v794_v55, %v774_v20 }
 0x2f7   : > { %v783_v28 = vadd.f32 %v782_v26, %v775_v23  ;;  %v796_v29 = vadd.f32 %v795_v57, %v776_v46 }
 0x2f9   : > { %v784_v30 = vrot.slane %v783_v28, 4  ;;  %v797_v31 = vrot.slane %v796_v29, 4 }
 0x2fb   : > { %v785_v1 = vadd.f32 %v784_v30, %v783_v28  ;;  %v798_v34 = vadd.f32 %v797_v31, %v796_v29 }
 0x2fd   : > { %v786_v36 = vrot.slane %v785_v1, 2  ;;  %v799_v37 = vrot.slane %v798_v34, 2 }
 0x2ff   : > { %v787_v38 = vadd.f32 %v786_v36, %v785_v1  ;;  %v800_v4 = vadd.f32 %v799_v37, %v798_v34 }
 0x301   : > { %v788_v39 = vrot.slane %v787_v38, 1  ;;  %v801_v40 = vrot.slane %v800_v4, 1 }
 0x303   : > { %v789_v41 = vadd.f32 %v788_v39, %v787_v38  ;;  %v802_v13 = vadd.f32 %v801_v40, %v800_v4 }
 0x305   : > { %v803_v43 = vmul.f32 0.00024291992, %v789_v41  ;;  %v804_v45 = vmul.f32 0.00024291992, %v802_v13  ;;  %v807_v48 = vmul.f32 -0.03125, %v789_v41  ;;  %v808_v16 = vmul.f32 -0.03125, %v802_v13 }
 0x307   : > { %v805_v49 = vmul.f32 %v803_v43, %v789_v41  ;;  %v806_v27 = vmul.f32 %v804_v45, %v802_v13 }
 0x309   : > { %v809_v50 = vadd.f32 %v807_v48, %v805_v49  ;;  %v810_v51 = vadd.f32 %v808_v16, %v806_v27 }
 0x30b   : > { %v812_v33 = vsel %vm811_vm1, %v809_v50, 0.0  ;;  %v813_v52 = vsel %vm811_vm1, %v810_v51, 0.0 }
 0x30c   : > { %v814_v53 = vadd.f32 %v813_v52, %v812_v33 }
 0x30e   : > { %815 = vadd.xlane.f32.xlu0 %v814_v53 }
 0x381   : > { %v816_v44 = vpop.xlane.xlu0 %815 }
 0x382   : > { %v817_v54 = vrot.slane %v816_v44, 4 }
 0x384   : > { %v818_v47 = vadd.f32 %v817_v54, %v816_v44 }
 0x386   : > { %v819_v56 = vrot.slane %v818_v47, 2 }
 0x388   : > { %v820_v58 = vadd.f32 %v819_v56, %v818_v47 }
 0x38a   : > { %v821_v59 = vrot.slane %v820_v58, 1 }
 0x38c   : > { %v822_v60 = vadd.f32 %v821_v59, %v820_v58 }
 0x38e   : > { %1096 = vpush %v822_v60 }
 0x3bf   : > { %s1097_s27 = spop %1096 }
 0x3c0   : > { %v825_v62 = vstv %s1097_s27 }
 0x3c1   : > { %v826_v63 = vadd.f32 %v825_v62, %v824_v61 }
 0x3c3   : > { %827 = vst [vmem:[%s1778_s29] sm:$0xff] %v826_v63 }
 0x3c4 PF: > { %s1064_s25 = sshll.u32 %s1431_s19, 1  ;;  %s843_s23 = sshll.u32 %s1778_s29, 4  ;;  %s844_s23 = int_to_ptr.vmem [resolvable:$true] %s843_s23 }
 0x3c5   : > { %s839_s6 = sadd.s32 %s1427_s18, %s1064_s25  ;;  %s1902_s7 = sld [smem:[#allocation18_spill]] }
 0x3c6   : > { %s1065_s4 = sshll.u32 %s839_s6, 3  ;;  %s829_s0 = scalar_lea.sflag [#allocation4], %s217_s28 }
 0x3cb   : > { %s841_s2 = scalar_lea.hbm %s1902_s7, %s1065_s4  ;;  %s1313_s3 = scalar_lea.hbm %s1902_s7, 32 }
 0x3cc   : > { %s845_s15 = sshll.u32 %s841_s2, 4  ;;  %s846_s15 = int_to_ptr.hbm [resolvable:$true] %s845_s15 }
 0x3cd   : > { %s1307_s20 = sshra.s32 %s846_s15, 4  ;;  %s1308_s20 = int_to_ptr.hbm [resolvable:$true] %s1307_s20 }
 0x3ce   : > { %s1309_s30 = scalar_lea.hbm %s1308_s20, 8  ;;  %p1314_p8 = scmp.lt.s32.totalorder %s1308_s20, %s1902_s7 }
 0x3cf   : > { %p1310_p7 = scmp.ne.s32.totalorder %s1308_s20, %s1309_s30  ;;  %p1315_p9 = scmp.lt.s32.totalorder %s1313_s3, %s1309_s30 }
 0x3d1   : > { %p1311_p11 = pnand %p1310_p7, %p1609_p13  ;;  %p1316_p1 = por %p1315_p9, %p1314_p8 }
 0x3d3   : > { %p1312_p2 = pneg %p1311_p11 }
 0x3d5   : > { %p1317_p10 = pnand %p1316_p1, %p1312_p2 }
 0x3d7   : > { %1320 = shalt.err (!%p1317_p10)
}
 0x3d8   : > { %1102 = dma.vmem_to_hbm [thread:$0]  (%p1609_p13), %s844_s23, 128, %s846_s15, %s829_s0  }
 0x3d9 PF: > { %p1116_p12 = scmp.ge.s32.totalorder %s1443_s22, 2  ;;  %s857_s28 = sand.u32 1, %s1391_s9  }
 0x3da   : > { %s858_s27 = scalar_lea.sflag [#allocation4], %s857_s28 }
 0x3db   : > { %p1112_p3 = pnand %p1116_p12, %p1625_p5 }
 0x3dd   : > { %p1113_p0 = pneg %p1112_p3 }
 0x3df   : > { %1386 = dma.done.wait (%p1113_p0), %s858_s27, 128  }
 0x3e0   : > { %1388 = vsyncadd (%p1113_p0), %s858_s27, 4294967168  ;;  %s21_s22 = sadd.s32 1, %s1443_s22   ;;  %s1904_s26 = sld [smem:[#allocation15_spill]] }
 0x3e1   : > { %p1824_p4 = scmp.ge.s32.totalorder %s21_s22, 6   ;;  %s1905_s21 = sld [smem:[#allocation16_spill]] }
 0x3e2   : > { %s1906_s18 = sld [smem:[#allocation11_spill]]  ;;  %s1910_s9 = smov %s1395_s10 }
 0x3e3   : > { %s1907_s19 = sld [smem:[#allocation12_spill]]  ;;  %s1911_s10 = smov %s1399_s11 }
 0x3e4   : > { %s1908_s20 = sld [smem:[#allocation13_spill]]  ;;  %s1912_s11 = smov %s1619_s8 }
 0x3e5   : > { %s1909_s6 = sld [smem:[#allocation14_spill]]  ;;  %s1913_s12 = smov %s1407_s13 }
 0x3e6   : > { %s1914_s13 = smov %s1411_s14  ;;  %s1915_s14 = smov %s1904_s26 }
 0x3e7   : > { %s1916_s15 = smov %s1419_s16  ;;  %s1917_s16 = smov %s1423_s17 }
 0x3e8   : > { %s1918_s17 = smov %s1905_s21  ;;  %20 = sbr.rel (!%p1824_p4) target bundleno = 15 (0xf), region = 90 }
 0x3eb   : > { %s1919_s21 = smov %s1909_s6 }
 0x3ed   :  { %864 = vsyncpa [#allocation3], 1 }
 0x3ee   :  { %866 = vsyncpa [#allocation3 + $0x1], 1 }
 0x3ef   :  { %867 = vsyncpa [#allocation6], 1 }
 0x3f0   :  { %869 = vsyncpa [#allocation6 + $0x1], 1 }
 0x3f1   :  { %870 = vsyncpa [#allocation4], 1 }
 0x3f2   :  { %872 = vsyncpa [#allocation4 + $0x1], 1 }

</bundles_post_ra>
